<compile_context>
chip_gen: v6e
topology: v6e:2x2x1
jax: 0.10.0
libtpu: 0.0.40
codegen_flags: <defaults>
</compile_context>

<pallas_src>
import functools

import jax
import jax.numpy as jnp
from jax.experimental import pallas as pl
from jax.experimental.pallas import tpu as pltpu


def _layernorm_kernel(x_ref, a_ref, b_ref, o_ref, *, eps):
    """Unpacked path: one original row per tile row (F on the lane axis)."""
    x = x_ref[...].astype(jnp.float32)            # (TR, F)
    n = x.shape[-1]
    mean = jnp.sum(x, axis=-1, keepdims=True) * (1.0 / n)
    d = x - mean
    # Two-pass, Bessel-corrected (N-1) variance, as in torch.Tensor.std.
    var = jnp.sum(d * d, axis=-1, keepdims=True) * (1.0 / (n - 1))
    inv = 1.0 / (jnp.sqrt(var) + eps)             # eps added to std, not var
    a = a_ref[...].astype(jnp.float32)
    b = b_ref[...].astype(jnp.float32)
    o_ref[...] = (d * inv * a + b).astype(o_ref.dtype)


def _layernorm_packed_kernel(x_ref, a_ref, b_ref, o_ref, *, eps, features, pack):
    """Lane-dense path: `pack` original rows live side-by-side on the lanes."""
    x = x_ref[...].astype(jnp.float32)            # (TR, pack*features) = (TR, 128)
    a = a_ref[...].astype(jnp.float32)            # (1, pack*features), pre-tiled
    b = b_ref[...].astype(jnp.float32)
    inv_n = 1.0 / features
    inv_nm1 = 1.0 / (features - 1)
    pieces = []
    for g in range(pack):                         # static unroll, pack <= 16
        xg = x[:, g * features:(g + 1) * features]
        mean = jnp.sum(xg, axis=-1, keepdims=True) * inv_n
        d = xg - mean
        var = jnp.sum(d * d, axis=-1, keepdims=True) * inv_nm1
        inv = 1.0 / (jnp.sqrt(var) + eps)
        pieces.append(d * inv)
    y = jnp.concatenate(pieces, axis=-1) if pack > 1 else pieces[0]
    o_ref[...] = (y * a + b).astype(o_ref.dtype)


def layer_norm(x, a_2, b_2, *, eps=1e-6, tile_rows=None):
    """LayerNorm over the last axis of x, matching the PyTorch reference."""
    orig_shape = x.shape
    features = orig_shape[-1]
    if features < 2:
        raise ValueError("Bessel-corrected std needs features >= 2")

    x2d = x.reshape(-1, features)                 # view-only, no HBM copy
    rows = x2d.shape[0]
    itemsize = jnp.dtype(x.dtype).itemsize
    # Sublane packing: 8 rows for 32-bit, 16 for bf16/f16, 32 for 8-bit.
    sublane = max(8, 32 // max(itemsize, 1))

    # Lane-dense packing for small F (the biggest single lever per review).
    pack = 1
    if 8 <= features < 128 and 128 % features == 0 and rows % (128 // features) == 0:
        pack = 128 // features
    f_eff = features * pack
    rows_eff = rows // pack
    x_eff = x2d.reshape(rows_eff, f_eff)          # still view-only (contiguous)
    a_eff = jnp.tile(a_2.reshape(1, features), (1, pack))
    b_eff = jnp.tile(b_2.reshape(1, features), (1, pack))

    # ---- tile-height selection ------------------------------------------
    if tile_rows is None:
        target_f32_bytes = 4 << 20                # ~4 MiB f32 footprint / block
        tr = max(1, target_f32_bytes // max(f_eff * 4, 1))
    else:
        tr = max(1, int(tile_rows))
    if tr >= rows_eff:
        if rows_eff >= 2 * sublane:
            # Everything would fit in one block: still split into >= 2 grid
            # steps so both v7x TensorCores get work on this DMA-bound kernel.
            tr = (((rows_eff + 1) // 2) + sublane - 1) // sublane * sublane
        else:
            tr = rows_eff                         # single full-extent block
    else:
        tr = max(sublane, (tr // sublane) * sublane)

    # ---- VMEM budget: never clamp the limit below the requirement; shrink
    # the tile instead if it would exceed what is safe on every generation
    # (v7x physical VMEM is only 64 MiB). -----------------------------------
    vmem_cap = 48 << 20

    def vmem_need(tr_):
        io = tr_ * f_eff * itemsize               # one in / out block
        f32 = tr_ * f_eff * 4                     # one f32 working tile
        return 4 * io + 6 * f32 + (2 << 20)       # dbl-buffered io + temps + slack

    while vmem_need(tr) > vmem_cap and tr > sublane:
        tr = max(sublane, ((tr // 2) // sublane) * sublane)
    vmem_limit = int(max(16 << 20, vmem_need(tr)))

    grid = (pl.cdiv(rows_eff, tr),)

    if pack > 1:
        kernel = functools.partial(
            _layernorm_packed_kernel, eps=eps, features=features, pack=pack)
    else:
        kernel = functools.partial(_layernorm_kernel, eps=eps)

    out = pl.pallas_call(
        kernel,
        out_shape=jax.ShapeDtypeStruct((rows_eff, f_eff), x.dtype),
        grid_spec=pltpu.PrefetchScalarGridSpec(
            num_scalar_prefetch=0,
            grid=grid,
            in_specs=[
                pl.BlockSpec((tr, f_eff), lambda i: (i, 0)),
                pl.BlockSpec((1, f_eff), lambda i: (0, 0)),
                pl.BlockSpec((1, f_eff), lambda i: (0, 0)),
            ],
            out_specs=pl.BlockSpec((tr, f_eff), lambda i: (i, 0)),
        ),
        compiler_params=pltpu.CompilerParams(
            dimension_semantics=("parallel",),
            vmem_limit_bytes=vmem_limit,
        ),
    )(x_eff, a_eff, b_eff)

    return out.reshape(orig_shape)


def _reference(x, a, b, eps):
    mean = jnp.mean(x, axis=-1, keepdims=True)
    var = jnp.sum((x - mean) ** 2, axis=-1, keepdims=True) / (x.shape[-1] - 1)
    std = jnp.sqrt(var)
    return a * (x - mean) / (std + eps) + b


if __name__ == "__main__":
    key = jax.random.PRNGKey(0)
    eps = 1e-6

    # Primary shape from the module context (batch=2, seq=8, hidden=32) with
    # the module's parameter init (ones / zeros).
    k0, k1, k2, k3, k4 = jax.random.split(key, 5)
    batch, seq, features = 2, 8, 32
    x = jax.random.normal(k0, (batch, seq, features), dtype=jnp.float32)
    a_2 = jnp.ones((features,), dtype=jnp.float32)
    b_2 = jnp.zeros((features,), dtype=jnp.float32)

    out = jax.block_until_ready(layer_norm(x, a_2, b_2, eps=eps))
    ref = _reference(x, a_2, b_2, eps)
    assert jnp.allclose(out, ref, atol=2e-5, rtol=2e-5), "mismatch (packed, 32)"

    # Extra checks with non-trivial a/b: packed path with a full sublane group,
    # and the unpacked fallback path (F=160, not a divisor of 128) with grid=2.
    for shape, kk in (((2, 16, 32), k1), ((2, 8, 160), k2)):
        f = shape[-1]
        xx = jax.random.normal(kk, shape, dtype=jnp.float32) * 2.0 + 1.5
        aa = jax.random.normal(k3, (f,), dtype=jnp.float32)
        bb = jax.random.normal(k4, (f,), dtype=jnp.float32)
        oo = jax.block_until_ready(layer_norm(xx, aa, bb, eps=eps))
        rr = _reference(xx, aa, bb, eps)
        assert jnp.allclose(oo, rr, atol=2e-5, rtol=2e-5), f"mismatch {shape}"

    print("KERNEL_OK")
</pallas_src>

<mosaic_0001>
module attributes {stable_mosaic.version = 11 : i64} {
  func.func @_layernorm_packed_kernel(%arg0: i32, %arg1: memref<4x128xf32, #tpu.memory_space<vmem>>, %arg2: memref<1x128xf32, #tpu.memory_space<vmem>>, %arg3: memref<1x128xf32, #tpu.memory_space<vmem>>, %arg4: memref<4x128xf32, #tpu.memory_space<vmem>>) attributes {dimension_semantics = [#tpu.dimension_semantics<parallel>], iteration_bounds = array<i64: 1>, scalar_prefetch = 0 : i64, scratch_operands = 0 : i64, tpu.core_type = #tpu.core_type<tc>, window_params = [{transform_indices = @transform_0, window_bounds = array<i64: 4, 128>}, {pipeline_mode = #tpu.pipeline_mode<synchronous>, transform_indices = @transform_1, window_bounds = array<i64: 1, 128>}, {pipeline_mode = #tpu.pipeline_mode<synchronous>, transform_indices = @transform_2, window_bounds = array<i64: 1, 128>}, {transform_indices = @transform_3, window_bounds = array<i64: 4, 128>}]} {
    %c0 = arith.constant 0 : index
    %c0_0 = arith.constant 0 : index
    %0 = vector.load %arg1[%c0, %c0_0] : memref<4x128xf32, #tpu.memory_space<vmem>>, vector<4x128xf32>
    %c0_1 = arith.constant 0 : index
    %c0_2 = arith.constant 0 : index
    %1 = vector.load %arg2[%c0_1, %c0_2] : memref<1x128xf32, #tpu.memory_space<vmem>>, vector<1x128xf32>
    %c0_3 = arith.constant 0 : index
    %c0_4 = arith.constant 0 : index
    %2 = vector.load %arg3[%c0_3, %c0_4] : memref<1x128xf32, #tpu.memory_space<vmem>>, vector<1x128xf32>
    %3 = vector.extract_strided_slice %0 {offsets = [0, 0], sizes = [4, 32], strides = [1, 1]} : vector<4x128xf32> to vector<4x32xf32>
    %cst = arith.constant dense<0.000000e+00> : vector<4xf32>
    %4 = vector.multi_reduction <add>, %3, %cst [1] : vector<4x32xf32> to vector<4xf32>
    %5 = vector.shape_cast %4 : vector<4xf32> to vector<4x1xf32>
    %cst_5 = arith.constant 3.125000e-02 : f32
    %6 = vector.broadcast %cst_5 : f32 to vector<4x1xf32>
    %7 = arith.mulf %5, %6 : vector<4x1xf32>
    %8 = vector.broadcast %7 : vector<4x1xf32> to vector<4x32xf32>
    %9 = arith.subf %3, %8 : vector<4x32xf32>
    %10 = arith.mulf %9, %9 : vector<4x32xf32>
    %cst_6 = arith.constant dense<0.000000e+00> : vector<4xf32>
    %11 = vector.multi_reduction <add>, %10, %cst_6 [1] : vector<4x32xf32> to vector<4xf32>
    %12 = vector.shape_cast %11 : vector<4xf32> to vector<4x1xf32>
    %cst_7 = arith.constant 0.0322580636 : f32
    %13 = vector.broadcast %cst_7 : f32 to vector<4x1xf32>
    %14 = arith.mulf %12, %13 : vector<4x1xf32>
    %15 = math.sqrt %14 : vector<4x1xf32>
    %cst_8 = arith.constant 9.99999997E-7 : f32
    %16 = vector.broadcast %cst_8 : f32 to vector<4x1xf32>
    %17 = arith.addf %15, %16 : vector<4x1xf32>
    %cst_9 = arith.constant 1.000000e+00 : f32
    %18 = vector.broadcast %cst_9 : f32 to vector<4x1xf32>
    %19 = arith.divf %18, %17 : vector<4x1xf32>
    %20 = vector.broadcast %19 : vector<4x1xf32> to vector<4x32xf32>
    %21 = arith.mulf %9, %20 : vector<4x32xf32>
    %22 = vector.extract_strided_slice %0 {offsets = [0, 32], sizes = [4, 32], strides = [1, 1]} : vector<4x128xf32> to vector<4x32xf32>
    %cst_10 = arith.constant dense<0.000000e+00> : vector<4xf32>
    %23 = vector.multi_reduction <add>, %22, %cst_10 [1] : vector<4x32xf32> to vector<4xf32>
    %24 = vector.shape_cast %23 : vector<4xf32> to vector<4x1xf32>
    %cst_11 = arith.constant 3.125000e-02 : f32
    %25 = vector.broadcast %cst_11 : f32 to vector<4x1xf32>
    %26 = arith.mulf %24, %25 : vector<4x1xf32>
    %27 = vector.broadcast %26 : vector<4x1xf32> to vector<4x32xf32>
    %28 = arith.subf %22, %27 : vector<4x32xf32>
    %29 = arith.mulf %28, %28 : vector<4x32xf32>
    %cst_12 = arith.constant dense<0.000000e+00> : vector<4xf32>
    %30 = vector.multi_reduction <add>, %29, %cst_12 [1] : vector<4x32xf32> to vector<4xf32>
    %31 = vector.shape_cast %30 : vector<4xf32> to vector<4x1xf32>
    %cst_13 = arith.constant 0.0322580636 : f32
    %32 = vector.broadcast %cst_13 : f32 to vector<4x1xf32>
    %33 = arith.mulf %31, %32 : vector<4x1xf32>
    %34 = math.sqrt %33 : vector<4x1xf32>
    %cst_14 = arith.constant 9.99999997E-7 : f32
    %35 = vector.broadcast %cst_14 : f32 to vector<4x1xf32>
    %36 = arith.addf %34, %35 : vector<4x1xf32>
    %cst_15 = arith.constant 1.000000e+00 : f32
    %37 = vector.broadcast %cst_15 : f32 to vector<4x1xf32>
    %38 = arith.divf %37, %36 : vector<4x1xf32>
    %39 = vector.broadcast %38 : vector<4x1xf32> to vector<4x32xf32>
    %40 = arith.mulf %28, %39 : vector<4x32xf32>
    %41 = vector.extract_strided_slice %0 {offsets = [0, 64], sizes = [4, 32], strides = [1, 1]} : vector<4x128xf32> to vector<4x32xf32>
    %cst_16 = arith.constant dense<0.000000e+00> : vector<4xf32>
    %42 = vector.multi_reduction <add>, %41, %cst_16 [1] : vector<4x32xf32> to vector<4xf32>
    %43 = vector.shape_cast %42 : vector<4xf32> to vector<4x1xf32>
    %cst_17 = arith.constant 3.125000e-02 : f32
    %44 = vector.broadcast %cst_17 : f32 to vector<4x1xf32>
    %45 = arith.mulf %43, %44 : vector<4x1xf32>
    %46 = vector.broadcast %45 : vector<4x1xf32> to vector<4x32xf32>
    %47 = arith.subf %41, %46 : vector<4x32xf32>
    %48 = arith.mulf %47, %47 : vector<4x32xf32>
    %cst_18 = arith.constant dense<0.000000e+00> : vector<4xf32>
    %49 = vector.multi_reduction <add>, %48, %cst_18 [1] : vector<4x32xf32> to vector<4xf32>
    %50 = vector.shape_cast %49 : vector<4xf32> to vector<4x1xf32>
    %cst_19 = arith.constant 0.0322580636 : f32
    %51 = vector.broadcast %cst_19 : f32 to vector<4x1xf32>
    %52 = arith.mulf %50, %51 : vector<4x1xf32>
    %53 = math.sqrt %52 : vector<4x1xf32>
    %cst_20 = arith.constant 9.99999997E-7 : f32
    %54 = vector.broadcast %cst_20 : f32 to vector<4x1xf32>
    %55 = arith.addf %53, %54 : vector<4x1xf32>
    %cst_21 = arith.constant 1.000000e+00 : f32
    %56 = vector.broadcast %cst_21 : f32 to vector<4x1xf32>
    %57 = arith.divf %56, %55 : vector<4x1xf32>
    %58 = vector.broadcast %57 : vector<4x1xf32> to vector<4x32xf32>
    %59 = arith.mulf %47, %58 : vector<4x32xf32>
    %60 = vector.extract_strided_slice %0 {offsets = [0, 96], sizes = [4, 32], strides = [1, 1]} : vector<4x128xf32> to vector<4x32xf32>
    %cst_22 = arith.constant dense<0.000000e+00> : vector<4xf32>
    %61 = vector.multi_reduction <add>, %60, %cst_22 [1] : vector<4x32xf32> to vector<4xf32>
    %62 = vector.shape_cast %61 : vector<4xf32> to vector<4x1xf32>
    %cst_23 = arith.constant 3.125000e-02 : f32
    %63 = vector.broadcast %cst_23 : f32 to vector<4x1xf32>
    %64 = arith.mulf %62, %63 : vector<4x1xf32>
    %65 = vector.broadcast %64 : vector<4x1xf32> to vector<4x32xf32>
    %66 = arith.subf %60, %65 : vector<4x32xf32>
    %67 = arith.mulf %66, %66 : vector<4x32xf32>
    %cst_24 = arith.constant dense<0.000000e+00> : vector<4xf32>
    %68 = vector.multi_reduction <add>, %67, %cst_24 [1] : vector<4x32xf32> to vector<4xf32>
    %69 = vector.shape_cast %68 : vector<4xf32> to vector<4x1xf32>
    %cst_25 = arith.constant 0.0322580636 : f32
    %70 = vector.broadcast %cst_25 : f32 to vector<4x1xf32>
    %71 = arith.mulf %69, %70 : vector<4x1xf32>
    %72 = math.sqrt %71 : vector<4x1xf32>
    %cst_26 = arith.constant 9.99999997E-7 : f32
    %73 = vector.broadcast %cst_26 : f32 to vector<4x1xf32>
    %74 = arith.addf %72, %73 : vector<4x1xf32>
    %cst_27 = arith.constant 1.000000e+00 : f32
    %75 = vector.broadcast %cst_27 : f32 to vector<4x1xf32>
    %76 = arith.divf %75, %74 : vector<4x1xf32>
    %77 = vector.broadcast %76 : vector<4x1xf32> to vector<4x32xf32>
    %78 = arith.mulf %66, %77 : vector<4x32xf32>
    %79 = tpu.concatenate %21, %40, %59, %78 in 1 : vector<4x32xf32>, vector<4x32xf32>, vector<4x32xf32>, vector<4x32xf32> -> vector<4x128xf32>
    %80 = vector.broadcast %1 : vector<1x128xf32> to vector<4x128xf32>
    %81 = arith.mulf %79, %80 : vector<4x128xf32>
    %82 = vector.broadcast %2 : vector<1x128xf32> to vector<4x128xf32>
    %83 = arith.addf %81, %82 : vector<4x128xf32>
    %c0_28 = arith.constant 0 : index
    %c0_29 = arith.constant 0 : index
    %84 = vector.load %arg4[%c0_28, %c0_29] : memref<4x128xf32, #tpu.memory_space<vmem>>, vector<4x128xf32>
    tpu.vector_store %arg4[%c0_28, %c0_29], %83 {strides = array<i32>} : memref<4x128xf32, #tpu.memory_space<vmem>>, vector<4x128xf32>,
    return
  }
  func.func @transform_0(%arg0: i32) -> (i32, i32) {
    %c0_i32 = arith.constant 0 : i32
    %c0_i32_0 = arith.constant 0 : i32
    return %arg0, %c0_i32 : i32, i32
  }
  func.func @transform_1(%arg0: i32) -> (i32, i32) {
    %c0_i32 = arith.constant 0 : i32
    %c0_i32_0 = arith.constant 0 : i32
    %c0_i32_1 = arith.constant 0 : i32
    return %c0_i32, %c0_i32_0 : i32, i32
  }
  func.func @transform_2(%arg0: i32) -> (i32, i32) {
    %c0_i32 = arith.constant 0 : i32
    %c0_i32_0 = arith.constant 0 : i32
    %c0_i32_1 = arith.constant 0 : i32
    return %c0_i32, %c0_i32_0 : i32, i32
  }
  func.func @transform_3(%arg0: i32) -> (i32, i32) {
    %c0_i32 = arith.constant 0 : i32
    %c0_i32_0 = arith.constant 0 : i32
    return %arg0, %c0_i32 : i32, i32
  }
}

</mosaic_0001>

<bundles_post_ra>
// kernel: tpu_custom_call.1
= control target key start
LH: loop header
LB: loop body
LE: loop exit
PB: predicated region body
PF: predicated region fallthrough
CT: control target
= control target key end

     0   :  { %8 = vsyncpa [#allocation3], 0  ;;  %s305_s0 = inlined_call_operand.hbm [shape: f32[4,128], index: 0, kind: input, shape index: {}]   ;;  %s306_s1 = inlined_call_operand.vmem [shape: f32[1,128], index: 1, kind: input, shape index: {}]   ;;  %s307_s2 = inlined_call_operand.vmem [shape: f32[1,128], index: 2, kind: input, shape index: {}]   ;;  %s308_s3 = inlined_call_operand.hbm [shape: f32[4,128], index: 3, kind: output, shape index: {}]  }
   0x1   :  { %9 = vsyncpa [#allocation4], 0  ;;  %s240_s12 = smov [#allocation2]  }
   0x2   :  { %s16_s13 = sshll.u32 %s240_s12, 4  ;;  %s17_s13 = int_to_ptr.vmem [resolvable:$true] %s16_s13 }
   0x3   :  { %s204_s14 = scalar_lea.vmem %s17_s13, 64  ;;  %p209_p1 = scmp.lt.s32.totalorder %s17_s13, %s17_s13 }
   0x4   :  { %p205_p0 = scmp.ne.s32.totalorder %s17_s13, %s204_s14  ;;  %p210_p2 = scmp.lt.s32.totalorder %s204_s14, %s204_s14 }
   0x6   :  { %p211_p3 = por %p210_p2, %p209_p1 }
   0x8   :  { %p212_p4 = pnand %p211_p3, %p205_p0 }
   0xa   :  { %215 = shalt.err (!%p212_p4)
}
   0xb   :  { %19 = dma.hbm_to_vmem [thread:$0]  %s305_s0, 64, %s17_s13, [#allocation3]  }
   0xc   :  { %236 = dma.done.wait [#allocation3], 64  }
   0xd   :  { %237 = vsyncadd [#allocation3], 4294967232  ;;  %v27_v0 = vld [vmem:[#allocation2] sm:$0xf]  ;;  %s241_s17 = smov 96   ;;  %s242_s18 = smov 32  }
   0xe   :  { %53 = vrot.lane.b32.xlu0 %v27_v0, %s241_s17  ;;  %109 = vrot.lane.b32.xlu1 %v27_v0, %s242_s18  ;;  %s243_s19 = smov 64   ;;  %vm30_vm0 = vcmask 257024   ;;  %vm137_vm9 = vcmask 261120   ;;  %vm139_vm10 = vcmask 523264   ;;  %vm141_vm11 = vcmask 785408   ;;  %s244_s23 = smov [#allocation5]  }
   0xf   :  { %v31_v3 = vsel %vm30_vm0, %v27_v0, 0.0  ;;  %s164_s24 = sshll.u32 %s244_s23, 4  ;;  %s165_s24 = int_to_ptr.vmem [resolvable:$true] %s164_s24 }
  0x10   :  { %s216_s25 = scalar_lea.vmem %s165_s24, 64  ;;  %p221_p6 = scmp.lt.s32.totalorder %s165_s24, %s165_s24 }
  0x11   :  { %p217_p5 = scmp.ne.s32.totalorder %s165_s24, %s216_s25  ;;  %p222_p7 = scmp.lt.s32.totalorder %s216_s25, %s216_s25 }
  0x12   :  { %81 = vrot.lane.b32.xlu0 %v27_v0, %s243_s19 }
  0x13   :  { %p223_p8 = por %p222_p7, %p221_p6 }
  0x15   :  { %p224_p9 = pnand %p223_p8, %p217_p5 }
  0x80   :  { %v54_v1 = vpop.permute.xlu0 %53  ;;  %v110_v5 = vpop.permute.xlu1 %109 }
  0x81   :  { %v56_v2 = vsel %vm30_vm0, %v54_v1, 0.0  ;;  %v112_v7 = vsel %vm30_vm0, %v110_v5, 0.0 }
  0x82   :  { %57 = vadd.xlane.f32.xlu1 %v56_v2 }
  0x84   :  { %v82_v4 = vpop.permute.xlu0 %81 }
  0x85   :  { %v84_v6 = vsel %vm30_vm0, %v82_v4, 0.0 }
  0x86   :  { %85 = vadd.xlane.f32.xlu0 %v84_v6  ;;  %32 = vadd.xlane.f32.xlu1 %v31_v3  ;;  %v173_v6 = vld [vmem:[%s306_s1] ss:$0 sm:$0xff] }
  0x8a   :  { %113 = vadd.xlane.f32.xlu0 %v112_v7 }
 0x10b   :  { %v58_v8 = vpop.xlane.xlu1 %57 }
 0x10c   :  { %v59_v9 = vmul.f32 0.03125, %v58_v8 }
 0x10e   :  { %v272_v10 = vsub.f32 %v27_v0, %v59_v9 }
 0x10f   :  { %v86_v11 = vpop.xlane.xlu0 %85  ;;  %v33_v20 = vpop.xlane.xlu1 %32 }
 0x110   :  { %v87_v12 = vmul.f32 0.03125, %v86_v11  ;;  %v61_v13 = vmul.f32 %v272_v10, %v272_v10  ;;  %v34_v21 = vmul.f32 0.03125, %v33_v20 }
 0x112   :  { %v276_v14 = vsub.f32 %v27_v0, %v87_v12  ;;  %63 = vrot.lane.b32.xlu0 %v61_v13, %s241_s17  ;;  %v284_v22 = vsub.f32 %v27_v0, %v34_v21 }
 0x113   :  { %v114_v15 = vpop.xlane.xlu0 %113 }
 0x114   :  { %v115_v16 = vmul.f32 0.03125, %v114_v15  ;;  %v89_v17 = vmul.f32 %v276_v14, %v276_v14  ;;  %v36_v23 = vmul.f32 %v284_v22, %v284_v22 }
 0x116   :  { %v280_v18 = vsub.f32 %v27_v0, %v115_v16  ;;  %91 = vrot.lane.b32.xlu1 %v89_v17, %s243_s19  ;;  %v37_v24 = vsel %vm30_vm0, %v36_v23, 0.0 }
 0x118   :  { %v117_v19 = vmul.f32 %v280_v18, %v280_v18 }
 0x11a   :  { %119 = vrot.lane.b32.xlu1 %v117_v19, %s242_s18 }
 0x131   :  { %38 = vadd.xlane.f32.xlu0 %v37_v24 }
 0x184   :  { %v64_v25 = vpop.permute.xlu0 %63 }
 0x185   :  { %v66_v26 = vsel %vm30_vm0, %v64_v25, 0.0 }
 0x186   :  { %67 = vadd.xlane.f32.xlu1 %v66_v26 }
 0x188   :  { %v92_v27 = vpop.permute.xlu1 %91 }
 0x189   :  { %v94_v28 = vsel %vm30_vm0, %v92_v27, 0.0 }
 0x18a   :  { %95 = vadd.xlane.f32.xlu0 %v94_v28 }
 0x18c   :  { %v120_v29 = vpop.permute.xlu1 %119 }
 0x18d   :  { %v122_v30 = vsel %vm30_vm0, %v120_v29, 0.0 }
 0x18e   :  { %123 = vadd.xlane.f32.xlu0 %v122_v30 }
 0x1ba   :  { %v39_v31 = vpop.xlane.xlu0 %38 }
 0x1bb   :  { %v40_v32 = vmul.f32 0.032258064, %v39_v31 }
 0x1bd   :  { %180 = vrsqrt.f32 %v40_v32  ;;  %vm43_vm1 = vcmp.eq.f32.partialorder %v40_v32, inf  ;;  %v46_v41 = vand.u32 2147483648, %v40_v32  ;;  %vm45_vm2 = vcmp.eq.f32.partialorder %v40_v32, 0.0 }
 0x1ca   :  { %v181_v38 = vpop.eup %180 }
 0x1cb   :  { %v42_v40 = vmul.f32 %v181_v38, %v40_v32 }
 0x1cd   :  { %v44_v43 = vsel %vm43_vm1, %v40_v32, %v42_v40 }
 0x1ce   :  { %v47_v46 = vsel %vm45_vm2, %v46_v41, %v44_v43 }
 0x1cf   :  { %v48_v52 = vadd.f32 1e-06, %v47_v46 }
 0x20f   :  { %v68_v33 = vpop.xlane.xlu1 %67 }
 0x210   :  { %v69_v34 = vmul.f32 0.032258064, %v68_v33 }
 0x212   :  { %182 = vrsqrt.f32 %v69_v34  ;;  %vm72_vm3 = vcmp.eq.f32.partialorder %v69_v34, inf  ;;  %v75_v45 = vand.u32 2147483648, %v69_v34  ;;  %vm74_vm4 = vcmp.eq.f32.partialorder %v69_v34, 0.0 }
 0x213   :  { %v96_v35 = vpop.xlane.xlu0 %95 }
 0x214   :  { %v97_v36 = vmul.f32 0.032258064, %v96_v35 }
 0x216   :  { %184 = vrsqrt.f32 %v97_v36  ;;  %vm100_vm5 = vcmp.eq.f32.partialorder %v97_v36, inf  ;;  %v103_v53 = vand.u32 2147483648, %v97_v36  ;;  %vm102_vm6 = vcmp.eq.f32.partialorder %v97_v36, 0.0 }
 0x217   :  { %v124_v37 = vpop.xlane.xlu0 %123 }
 0x218   :  { %v125_v39 = vmul.f32 0.032258064, %v124_v37 }
 0x21a   :  { %186 = vrsqrt.f32 %v125_v39  ;;  %vm128_vm7 = vcmp.eq.f32.partialorder %v125_v39, inf  ;;  %v131_v59 = vand.u32 2147483648, %v125_v39  ;;  %vm130_vm8 = vcmp.eq.f32.partialorder %v125_v39, 0.0 }
 0x21f   :  { %v183_v42 = vpop.eup %182 }
 0x220   :  { %v71_v44 = vmul.f32 %v183_v42, %v69_v34 }
 0x222   :  { %v73_v47 = vsel %vm72_vm3, %v69_v34, %v71_v44 }
 0x223   :  { %v185_v48 = vpop.eup %184  ;;  %v76_v49 = vsel %vm74_vm4, %v75_v45, %v73_v47 }
 0x224   :  { %v77_v50 = vadd.f32 1e-06, %v76_v49  ;;  %v99_v51 = vmul.f32 %v185_v48, %v97_v36 }
 0x226   :  { %v101_v54 = vsel %vm100_vm5, %v97_v36, %v99_v51  ;;  %188 = vrcp.f32 %v77_v50 }
 0x227   :  { %v187_v55 = vpop.eup %186  ;;  %v104_v56 = vsel %vm102_vm6, %v103_v53, %v101_v54  ;;  %190 = vrcp.f32 %v48_v52 }
 0x228   :  { %v105_v57 = vadd.f32 1e-06, %v104_v56  ;;  %v127_v58 = vmul.f32 %v187_v55, %v125_v39 }
 0x22a   :  { %192 = vrcp.f32 %v105_v57  ;;  %v129_v60 = vsel %vm128_vm7, %v125_v39, %v127_v58 }
 0x22b   :  { %v132_v61 = vsel %vm130_vm8, %v131_v59, %v129_v60 }
 0x22c   :  { %v133_v62 = vadd.f32 1e-06, %v132_v61 }
 0x22e   :  { %194 = vrcp.f32 %v133_v62 }
 0x233   :  { %v189_v63 = vpop.eup %188 }
 0x234   :  { %v191_v0 = vpop.eup %190  ;;  %v80_v2 = vmul.f32 %v189_v63, %v272_v10  ;;  %v174_v10 = vld [vmem:[%s307_s2] ss:$0 sm:$0xff] }
 0x235   :  { %v51_v4 = vmul.f32 %v191_v0, %v284_v22 }
 0x237   :  { %v193_v1 = vpop.eup %192  ;;  %v138_v8 = vsel %vm137_vm9, %v51_v4, %v80_v2 }
 0x238   :  { %v108_v3 = vmul.f32 %v193_v1, %v276_v14 }
 0x23a   :  { %v140_v9 = vsel %vm139_vm10, %v138_v8, %v108_v3 }
 0x23b   :  { %v195_v5 = vpop.eup %194 }
 0x23c   :  { %v136_v7 = vmul.f32 %v195_v5, %v280_v18 }
 0x23e   :  { %v142_v11 = vsel %vm141_vm11, %v140_v9, %v136_v7 }
 0x23f   :  { %v149_v12 = vmul.f32 %v173_v6, %v142_v11 }
 0x241   :  { %v156_v13 = vadd.f32 %v174_v10, %v149_v12 }
 0x243   :  { %157 = vst [vmem:[#allocation5] sm:$0xf] %v156_v13 }
 0x244   :  { %227 = shalt.err (!%p224_p9)
}
 0x245   :  { %167 = dma.vmem_to_hbm [thread:$0]  %s165_s24, 64, %s308_s3, [#allocation4]  }
 0x246   :  { %238 = dma.done.wait [#allocation4], 64  }
 0x247   :  { %239 = vsyncadd [#allocation4], 4294967232 }
 0x248   :  { %171 = vsyncpa [#allocation3], 1 }
 0x249   :  { %172 = vsyncpa [#allocation4], 1 }

</bundles_post_ra>
